<compile_context>
chip_gen: v6e
topology: v6e:2x2x1
jax: 0.10.0
libtpu: 0.0.40
codegen_flags: <defaults>
</compile_context>

<pallas_src>
import jax
import jax.numpy as jnp
from jax.experimental import pallas as pl
from jax.experimental.pallas import tpu as pltpu


# ----------------------------------------------------------------------------
# Backward kernel: o = neg_lambda * g, with neg_lambda in SMEM.
# ----------------------------------------------------------------------------
def _neg_scale_kernel(g_ref, lam_ref, o_ref):
    # lam_ref is a (1,) f32 SMEM scalar holding -lambda. Multiply in f32 so
    # lambda is never quantized to bf16; the kernel is HBM-bound so the extra
    # VALU work is free filler.
    o_ref[...] = (g_ref[...].astype(jnp.float32) * lam_ref[0]).astype(o_ref.dtype)


# ----------------------------------------------------------------------------
# Layout / sizing helpers
# ----------------------------------------------------------------------------
_WIDTH_CANDIDATES = (2048, 1024, 512, 256, 128)


def _vmem_capacity_bytes():
    try:
        info = pltpu.get_tpu_info()
        cap = getattr(info, "vmem_capacity_bytes", None)
        if cap:
            return int(cap)
    except Exception:
        pass
    return 64 << 20  # conservative fallback: v7x has the smallest VMEM


def _pick_block_and_vmem_limit():
    """Chip-aware block bytes + scoped-VMEM limit."""
    cap = _vmem_capacity_bytes()
    if cap <= (64 << 20):
        # v7x-class (64 MiB VMEM, ~3.2 TB/s HBM): 8 MiB blocks amortize the
        # per-step overhead; 4 double-buffered tiles = 32 MiB.
        block_bytes = 8 << 20
    else:
        # v5e / v6e (128 MiB VMEM): 4 MiB blocks (16 MiB of buffers).
        block_bytes = 4 << 20
    vmem_limit = min(4 * block_bytes + (8 << 20), cap)
    return block_bytes, vmem_limit


def _choose_2d_layout(n):
    """Lane-dense (rows, width) factorization of n, or None if n % 128 != 0."""
    for w in _WIDTH_CANDIDATES:
        if n % w == 0:
            return n // w, w
    return None


def _row_tile(rows, width, itemsize, block_bytes):
    """Largest row-tile keeping a block near block_bytes, sublane-aligned."""
    sublane = max(8, 32 // itemsize)  # 8 (f32), 16 (bf16/f16), 32 (int8/fp8)
    tb = max(sublane, block_bytes // (width * itemsize))
    tb = (tb // sublane) * sublane
    if tb >= rows:
        return rows  # full array dim -> exempt from divisibility constraint
    return tb


# ----------------------------------------------------------------------------
# Backward wrapper: tiled, lane-dense, copy-free streaming scale
# ----------------------------------------------------------------------------
def _neg_scale_pallas(g, neg_lam):
    """dx = neg_lam * g. neg_lam is a scalar (Python number or f32 array)."""
    orig_shape = g.shape
    n = g.size
    if n == 0:
        return g

    neg_lam_f32 = jnp.asarray(neg_lam, dtype=jnp.float32)
    itemsize = jnp.dtype(g.dtype).itemsize
    block_bytes, vmem_limit = _pick_block_and_vmem_limit()

    layout = _choose_2d_layout(n)
    if layout is not None:
        rows, width = layout
    else:
        # No padding/slicing copies: keep the original trailing dim as the
        # (full-extent, divisibility-exempt) last block dim.
        width = orig_shape[-1] if g.ndim >= 1 else 1
        sublane = max(8, 32 // itemsize)
        if g.ndim >= 2 and width * itemsize * sublane <= block_bytes:
            rows = n // width
        else:
            # Rare 1-D / oversized-row case: let XLA fuse the scale into the
            # surrounding backward graph (zero extra HBM traffic).
            return (g.astype(jnp.float32) * neg_lam_f32).astype(g.dtype)

    g2d = g.reshape(rows, width)
    lam1 = neg_lam_f32.reshape(1)
    tb = _row_tile(rows, width, itemsize, block_bytes)
    grid = (pl.cdiv(rows, tb),)

    out2d = pl.pallas_call(
        _neg_scale_kernel,
        out_shape=jax.ShapeDtypeStruct((rows, width), g2d.dtype),
        grid_spec=pltpu.PrefetchScalarGridSpec(
            num_scalar_prefetch=0,
            grid=grid,
            in_specs=[
                pl.BlockSpec((tb, width), lambda i: (i, 0)),
                pl.BlockSpec(memory_space=pltpu.MemorySpace.SMEM),
            ],
            out_specs=pl.BlockSpec((tb, width), lambda i: (i, 0)),
        ),
        compiler_params=pltpu.CompilerParams(
            dimension_semantics=("parallel",),
            vmem_limit_bytes=vmem_limit,
        ),
        cost_estimate=pl.CostEstimate(
            flops=n, transcendentals=0, bytes_accessed=2 * n * itemsize),
        input_output_aliases={0: 0},  # donate the upstream-grad buffer
    )(g2d, lam1)

    return out2d.reshape(orig_shape)


# ----------------------------------------------------------------------------
# GradientReversal module equivalent
# ----------------------------------------------------------------------------
@jax.custom_vjp
def _grl(x, neg_lambda):
    # Forward: identity. No kernel / no copy needed.
    return x


def _grl_fwd(x, neg_lambda):
    return x, neg_lambda


def _grl_bwd(neg_lambda, g):
    # Gradient w.r.t. x is -lambda * g; lambda gets a zero cotangent
    # (the torch reference returns None for it).
    return _neg_scale_pallas(g, neg_lambda), jnp.zeros_like(neg_lambda)


_grl.defvjp(_grl_fwd, _grl_bwd)


def gradient_reversal(x, lambda_):
    """lambda_ may be a Python float or a traced JAX scalar (schedules OK —
    the value is fed to the kernel through SMEM, so changing it never forces
    a recompile)."""
    neg_lam = -jnp.asarray(lambda_, dtype=jnp.float32)
    return _grl(x, neg_lam)


class GradientReversal:
    """JAX/Pallas equivalent of fairlib's GradientReversal(nn.Module)."""

    def __init__(self, lambda_):
        self.lambda_ = lambda_

    def __call__(self, x):
        return gradient_reversal(x, self.lambda_)


# ----------------------------------------------------------------------------
# Demo / smoke test
# ----------------------------------------------------------------------------
if __name__ == "__main__":
    key = jax.random.PRNGKey(0)
    lambda_ = 0.7
    grl = GradientReversal(lambda_)

    # Case 1: NCHW-like activation, size divisible by 128 (lane-dense path).
    x = jax.random.normal(key, (2, 4, 16, 16), dtype=jnp.float32)
    y = grl(x)
    jax.block_until_ready(y)
    assert y.shape == x.shape and y.dtype == x.dtype
    assert jnp.allclose(y, x), "forward must be identity"

    dx = jax.grad(lambda xx: jnp.sum(grl(xx)))(x)
    jax.block_until_ready(dx)
    assert jnp.allclose(dx, -lambda_ * jnp.ones_like(x), atol=1e-6), \
        "backward must be -lambda * upstream grad"

    # Case 2: awkward 2-D shape (size not a multiple of 128) — kernel runs
    # with a full-extent last block dim, no padding copies.
    x2 = jax.random.normal(jax.random.PRNGKey(1), (3, 50), dtype=jnp.float32)
    y2 = grl(x2)
    jax.block_until_ready(y2)
    assert jnp.allclose(y2, x2)
    dx2 = jax.grad(lambda xx: jnp.sum(grl(xx) * 2.0))(x2)
    jax.block_until_ready(dx2)
    assert jnp.allclose(dx2, -lambda_ * 2.0 * jnp.ones_like(x2), atol=1e-6)

    # Case 3: bf16 gradients (lambda held in f32 inside the kernel).
    x3 = jax.random.normal(jax.random.PRNGKey(2), (8, 128), dtype=jnp.bfloat16)
    dx3 = jax.grad(lambda xx: jnp.sum(grl(xx).astype(jnp.float32)))(x3)
    jax.block_until_ready(dx3)
    assert jnp.allclose(dx3.astype(jnp.float32),
                        -lambda_ * jnp.ones((8, 128), jnp.float32), atol=1e-2)

    # Case 4: 1-D awkward size — XLA-fused fallback path (no standalone kernel).
    x4 = jax.random.normal(jax.random.PRNGKey(3), (131,), dtype=jnp.float32)
    dx4 = jax.grad(lambda xx: jnp.sum(grl(xx)))(x4)
    jax.block_until_ready(dx4)
    assert jnp.allclose(dx4, -lambda_ * jnp.ones_like(x4), atol=1e-6)

    # Case 5: scheduled lambda as a traced scalar under jit — same compiled
    # executable serves every lambda value (no per-lambda recompile).
    grad_fn = jax.jit(
        lambda xx, lam: jax.grad(
            lambda z: jnp.sum(gradient_reversal(z, lam)))(xx))
    dx5a = grad_fn(x, jnp.float32(0.3))
    dx5b = grad_fn(x, jnp.float32(0.9))
    jax.block_until_ready((dx5a, dx5b))
    assert jnp.allclose(dx5a, -0.3 * jnp.ones_like(x), atol=1e-6)
    assert jnp.allclose(dx5b, -0.9 * jnp.ones_like(x), atol=1e-6)

    print("KERNEL_OK")
</pallas_src>

<mosaic_0001>
module attributes {stable_mosaic.version = 11 : i64} {
  func.func @_neg_scale_kernel(%arg0: i32, %arg1: memref<1x2048xf32, #tpu.memory_space<vmem>>, %arg2: memref<1xf32, #tpu.memory_space<smem>>, %arg3: memref<1x2048xf32, #tpu.memory_space<vmem>>) attributes {dimension_semantics = [#tpu.dimension_semantics<parallel>], iteration_bounds = array<i64: 1>, scalar_prefetch = 0 : i64, scratch_operands = 0 : i64, tpu.core_type = #tpu.core_type<tc>, window_params = [{transform_indices = @transform_0, window_bounds = array<i64: 1, 2048>}, {transform_indices = @transform_1, window_bounds = array<i64: 1>}, {transform_indices = @transform_2, window_bounds = array<i64: 1, 2048>}]} {
    %c0 = arith.constant 0 : index
    %c0_0 = arith.constant 0 : index
    %0 = vector.load %arg1[%c0, %c0_0] : memref<1x2048xf32, #tpu.memory_space<vmem>>, vector<1x2048xf32>
    %c0_1 = arith.constant 0 : index
    %1 = memref.load %arg2[%c0_1] : memref<1xf32, #tpu.memory_space<smem>>
    %2 = vector.broadcast %1 : f32 to vector<1x2048xf32>
    %3 = arith.mulf %0, %2 : vector<1x2048xf32>
    %c0_2 = arith.constant 0 : index
    %c0_3 = arith.constant 0 : index
    %4 = vector.load %arg3[%c0_2, %c0_3] : memref<1x2048xf32, #tpu.memory_space<vmem>>, vector<1x2048xf32>
    tpu.vector_store %arg3[%c0_2, %c0_3], %3 {strides = array<i32>} : memref<1x2048xf32, #tpu.memory_space<vmem>>, vector<1x2048xf32>,
    return
  }
  func.func @transform_0(%arg0: i32) -> (i32, i32) {
    %c0_i32 = arith.constant 0 : i32
    %c0_i32_0 = arith.constant 0 : i32
    return %arg0, %c0_i32 : i32, i32
  }
  func.func @transform_1(%arg0: i32) -> i32 {
    %c0_i32 = arith.constant 0 : i32
    %c0_i32_0 = arith.constant 0 : i32
    return %c0_i32 : i32
  }
  func.func @transform_2(%arg0: i32) -> (i32, i32) {
    %c0_i32 = arith.constant 0 : i32
    %c0_i32_0 = arith.constant 0 : i32
    return %arg0, %c0_i32 : i32, i32
  }
}

</mosaic_0001>

<bundles_post_ra>
// kernel: tpu_custom_call.1
= control target key start
LH: loop header
LB: loop body
LE: loop exit
PB: predicated region body
PF: predicated region fallthrough
CT: control target
= control target key end

     0   :  { %8 = vsyncpa [#allocation4], 0  ;;  %s120_s0 = inlined_call_operand.hbm [shape: f32[1,2048], index: 0, kind: input, shape index: {}, may-alias: {0,2}]   ;;  %s121_s1 = inlined_call_operand.<no memory space> [shape: f32[1], index: 1, kind: input, shape index: {}]   ;;  %s122_s2 = inlined_call_operand.hbm [shape: f32[1,2048], index: 2, kind: output, shape index: {}, may-alias: {0,2}]  }
   0x1   :  { %9 = vsyncpa [#allocation5], 0  ;;  %s94_s9 = smov [#allocation3]  }
   0x2   :  { %s16_s10 = sshll.u32 %s94_s9, 4  ;;  %s17_s10 = int_to_ptr.vmem [resolvable:$true] %s16_s10 }
   0x3   :  { %s58_s11 = scalar_lea.vmem %s17_s10, 256  ;;  %p63_p1 = scmp.lt.s32.totalorder %s17_s10, %s17_s10 }
   0x4   :  { %p59_p0 = scmp.ne.s32.totalorder %s17_s10, %s58_s11  ;;  %p64_p2 = scmp.lt.s32.totalorder %s58_s11, %s58_s11 }
   0x6   :  { %p65_p3 = por %p64_p2, %p63_p1 }
   0x8   :  { %p66_p4 = pnand %p65_p3, %p59_p0 }
   0xa   :  { %69 = shalt.err (!%p66_p4)
}
   0xb   :  { %19 = dma.hbm_to_vmem [thread:$0]  %s120_s0, 256, %s17_s10, [#allocation4]  }
   0xc   :  { %90 = dma.done.wait [#allocation4], 256  }
   0xd   :  { %91 = vsyncadd [#allocation4], 4294967040  ;;  %v28_v0 = vstv %s121_s1  ;;  %s95_s16 = smov [#allocation6]   ;;  %v25_v1 = vld [vmem:[#allocation3] sm:$0xff]  ;;  %v26_v2 = vld [vmem:[#allocation3 + $0x8] sm:$0xff] }
   0xe   :  { %s39_s17 = sshll.u32 %s95_s16, 4  ;;  %v29_v3 = vmul.f32 %v28_v0, %v25_v1  ;;  %v30_v4 = vmul.f32 %v28_v0, %v26_v2  ;;  %s40_s17 = int_to_ptr.vmem [resolvable:$true] %s39_s17 }
   0xf   :  { %s70_s18 = scalar_lea.vmem %s40_s17, 256  ;;  %p75_p6 = scmp.lt.s32.totalorder %s40_s17, %s40_s17 }
  0x10   :  { %31 = vst [vmem:[#allocation6] sm:$0xff] %v29_v3  ;;  %32 = vst [vmem:[#allocation6 + $0x8] sm:$0xff] %v30_v4  ;;  %p71_p5 = scmp.ne.s32.totalorder %s40_s17, %s70_s18  ;;  %p76_p7 = scmp.lt.s32.totalorder %s70_s18, %s70_s18 }
  0x12   :  { %p77_p8 = por %p76_p7, %p75_p6 }
  0x14   :  { %p78_p9 = pnand %p77_p8, %p71_p5 }
  0x16   :  { %81 = shalt.err (!%p78_p9)
}
  0x17   :  { %42 = dma.vmem_to_hbm [thread:$0]  %s40_s17, 256, %s122_s2, [#allocation5]  }
  0x18   :  { %92 = dma.done.wait [#allocation5], 256  }
  0x19   :  { %93 = vsyncadd [#allocation5], 4294967040 }
  0x1a   :  { %46 = vsyncpa [#allocation4], 1 }
  0x1b   :  { %47 = vsyncpa [#allocation5], 1 }

</bundles_post_ra>
